<compile_context>
chip_gen: v7x
topology: tpu7x:2x2x1
jax: 0.10.0
libtpu: 0.0.40
codegen_flags: <defaults>
</compile_context>

<pallas_src>
import functools

import jax
import jax.numpy as jnp
from jax.experimental import pallas as pl
from jax.experimental.pallas import tpu as pltpu

HIDDEN = 64
MAX_TILE_M = 4096            # rows per grid step (multiple of 8); sweepable
MIN_ROWS_FOR_TC_SPLIT = 256  # rows per core below which we don't force a 2-way split


def _round_up(n, m):
    return ((n + m - 1) // m) * m


def dqn_kernel(x_ref, w1_ref, b1_ref, w2_ref, b2_ref, w3_ref, b3_ref, o_ref):
    wd = w1_ref.dtype  # matmul-input dtype (f32 or bf16); accumulation is f32
    # fc1 + ReLU  (MXU matmul with f32 accumulate; bias-add/ReLU in f32 on VPU)
    h1 = jnp.dot(x_ref[...].astype(wd), w1_ref[...],
                 preferred_element_type=jnp.float32)
    h1 = jnp.maximum(h1 + b1_ref[...], 0.0)
    # fc2 + ReLU
    h2 = jnp.dot(h1.astype(wd), w2_ref[...],
                 preferred_element_type=jnp.float32)
    h2 = jnp.maximum(h2 + b2_ref[...], 0.0)
    # fc3 (no activation)
    out = jnp.dot(h2.astype(wd), w3_ref[...],
                  preferred_element_type=jnp.float32) + b3_ref[...]
    o_ref[...] = out.astype(o_ref.dtype)


def prepare_params(params, param_dtype=jnp.float32):
    """One-time parameter preparation. Call at init, NOT per forward step."""
    w1, b1, w2, b2, w3, b3 = params
    as2d = lambda b: b.reshape(1, -1).astype(jnp.float32)  # bias-add stays f32
    return (w1.astype(param_dtype), as2d(b1),
            w2.astype(param_dtype), as2d(b2),
            w3.astype(param_dtype), as2d(b3))


@functools.partial(jax.jit, static_argnames=("tile_m",))
def dqn_forward(x, prepared_params, tile_m=MAX_TILE_M):
    """Forward pass. x: (B, input_size) f32. Returns (B, output_size) f32."""
    w1, b1, w2, b2, w3, b3 = prepared_params
    B, in_size = x.shape
    out_size = w3.shape[1]

    # --- even batch tiling (dead rows < 8 per grid step) ---
    rows = _round_up(B, 8)
    n_steps = pl.cdiv(rows, tile_m)
    if rows >= 2 * MIN_ROWS_FOR_TC_SPLIT:
        n_steps = max(n_steps, 2)          # v7x: give both TensorCores work
    tm = _round_up(pl.cdiv(rows, n_steps), 8)
    b_pad = n_steps * tm
    xp = x if b_pad == B else jnp.pad(x, ((0, b_pad - B), (0, 0)))

    const = lambda i: (0, 0)  # weights/biases stay resident across the batch grid

    flops = 2 * b_pad * (in_size * HIDDEN + HIDDEN * HIDDEN + HIDDEN * out_size)
    bytes_accessed = (b_pad * in_size * 4
                      + sum(int(p.size) * p.dtype.itemsize for p in prepared_params)
                      + b_pad * out_size * 4)

    out = pl.pallas_call(
        dqn_kernel,
        out_shape=jax.ShapeDtypeStruct((b_pad, out_size), jnp.float32),
        grid=(n_steps,),
        in_specs=[
            pl.BlockSpec((tm, in_size), lambda i: (i, 0)),    # x tile
            pl.BlockSpec((in_size, HIDDEN), const),           # w1
            pl.BlockSpec((1, HIDDEN), const),                 # b1
            pl.BlockSpec((HIDDEN, HIDDEN), const),            # w2
            pl.BlockSpec((1, HIDDEN), const),                 # b2
            pl.BlockSpec((HIDDEN, out_size), const),          # w3
            pl.BlockSpec((1, out_size), const),               # b3
        ],
        out_specs=pl.BlockSpec((tm, out_size), lambda i: (i, 0)),
        compiler_params=pltpu.CompilerParams(
            dimension_semantics=("parallel",)),                # v7x: split batch over 2 TCs
        cost_estimate=pl.CostEstimate(
            flops=flops, transcendentals=0, bytes_accessed=bytes_accessed),
    )(xp, w1, b1, w2, b2, w3, b3)

    return out if b_pad == B else out[:B]


def init_linear(key, fan_in, fan_out):
    # Mimic PyTorch nn.Linear default init: U(-1/sqrt(fan_in), 1/sqrt(fan_in))
    kw, kb = jax.random.split(key)
    bound = 1.0 / jnp.sqrt(jnp.float32(fan_in))
    w = jax.random.uniform(kw, (fan_in, fan_out), jnp.float32, -bound, bound)
    b = jax.random.uniform(kb, (fan_out,), jnp.float32, -bound, bound)
    return w, b


def init_dqn_params(key, input_size, output_size):
    k1, k2, k3 = jax.random.split(key, 3)
    w1, b1 = init_linear(k1, input_size, HIDDEN)
    w2, b2 = init_linear(k2, HIDDEN, HIDDEN)
    w3, b3 = init_linear(k3, HIDDEN, output_size)
    return (w1, b1, w2, b2, w3, b3)


def dqn_reference(x, params):
    w1, b1, w2, b2, w3, b3 = params
    h1 = jnp.maximum(x @ w1 + b1, 0.0)
    h2 = jnp.maximum(h1 @ w2 + b2, 0.0)
    return h2 @ w3 + b3


if __name__ == "__main__":
    key = jax.random.PRNGKey(0)
    k_params, k_x1, k_x2 = jax.random.split(key, 3)

    batch, input_size, output_size = 8, 16, 4
    params = init_dqn_params(k_params, input_size, output_size)
    prepared_f32 = prepare_params(params)  # one-time, outside the hot path

    # Small batch: grid=(1,), no padding, no post-slice.
    x = jax.random.normal(k_x1, (batch, input_size), jnp.float32)
    ref = dqn_reference(x, params)
    out = jax.block_until_ready(dqn_forward(x, prepared_f32))
    assert out.shape == (batch, output_size), out.shape
    assert jnp.allclose(out, ref, atol=1e-4, rtol=1e-4), "f32 small-batch mismatch"

    # Larger, non-tile-aligned batch: exercises the multi-step grid, the even
    # tiling (tm=264, grid=(2,)), row padding, and the v7x 2-TC split.
    big = 520
    xb = jax.random.normal(k_x2, (big, input_size), jnp.float32)
    refb = dqn_reference(xb, params)
    outb = jax.block_until_ready(dqn_forward(xb, prepared_f32))
    assert outb.shape == (big, output_size), outb.shape
    assert jnp.allclose(outb, refb, atol=1e-4, rtol=1e-4), "f32 tiled mismatch"

    # Optional bf16 weight/activation path (f32 accumulation): loose tolerance.
    prepared_bf16 = prepare_params(params, param_dtype=jnp.bfloat16)
    out_bf16 = jax.block_until_ready(dqn_forward(x, prepared_bf16))
    assert out_bf16.shape == (batch, output_size), out_bf16.shape
    assert jnp.allclose(out_bf16, ref, atol=5e-2, rtol=5e-2), "bf16 mismatch"

    print("KERNEL_OK")
</pallas_src>

<mosaic_0001>
module attributes {stable_mosaic.version = 11 : i64} {
  func.func @dqn_kernel(%arg0: i32, %arg1: memref<8x16xf32, #tpu.memory_space<vmem>>, %arg2: memref<16x64xf32, #tpu.memory_space<vmem>>, %arg3: memref<1x64xf32, #tpu.memory_space<vmem>>, %arg4: memref<64x64xf32, #tpu.memory_space<vmem>>, %arg5: memref<1x64xf32, #tpu.memory_space<vmem>>, %arg6: memref<64x4xf32, #tpu.memory_space<vmem>>, %arg7: memref<1x4xf32, #tpu.memory_space<vmem>>, %arg8: memref<8x4xf32, #tpu.memory_space<vmem>>) attributes {dimension_semantics = [#tpu.dimension_semantics<parallel>], iteration_bounds = array<i64: 1>, scalar_prefetch = 0 : i64, scratch_operands = 0 : i64, tpu.core_type = #tpu.core_type<tc>, window_params = [{transform_indices = @transform_0, window_bounds = array<i64: 8, 16>}, {pipeline_mode = #tpu.pipeline_mode<synchronous>, transform_indices = @transform_1, window_bounds = array<i64: 16, 64>}, {pipeline_mode = #tpu.pipeline_mode<synchronous>, transform_indices = @transform_2, window_bounds = array<i64: 1, 64>}, {pipeline_mode = #tpu.pipeline_mode<synchronous>, transform_indices = @transform_3, window_bounds = array<i64: 64, 64>}, {pipeline_mode = #tpu.pipeline_mode<synchronous>, transform_indices = @transform_4, window_bounds = array<i64: 1, 64>}, {pipeline_mode = #tpu.pipeline_mode<synchronous>, transform_indices = @transform_5, window_bounds = array<i64: 64, 4>}, {pipeline_mode = #tpu.pipeline_mode<synchronous>, transform_indices = @transform_6, window_bounds = array<i64: 1, 4>}, {transform_indices = @transform_7, window_bounds = array<i64: 8, 4>}]} {
    %c0 = arith.constant 0 : index
    %c0_0 = arith.constant 0 : index
    %0 = vector.load %arg1[%c0, %c0_0] : memref<8x16xf32, #tpu.memory_space<vmem>>, vector<8x16xf32>
    %c0_1 = arith.constant 0 : index
    %c0_2 = arith.constant 0 : index
    %1 = vector.load %arg2[%c0_1, %c0_2] : memref<16x64xf32, #tpu.memory_space<vmem>>, vector<16x64xf32>
    %cst = arith.constant dense<0.000000e+00> : vector<8x64xf32>
    %2 = tpu.matmul %0, %1, %cst {dimension_numbers = #tpu.dot_dimension_numbers<[1], [0], [0], [1], [0, 0, 1, 1], [], []>} : vector<8x16xf32>, vector<16x64xf32>, vector<8x64xf32> -> vector<8x64xf32>
    %c0_3 = arith.constant 0 : index
    %c0_4 = arith.constant 0 : index
    %3 = vector.load %arg3[%c0_3, %c0_4] : memref<1x64xf32, #tpu.memory_space<vmem>>, vector<1x64xf32>
    %4 = vector.broadcast %3 : vector<1x64xf32> to vector<8x64xf32>
    %5 = arith.addf %2, %4 : vector<8x64xf32>
    %cst_5 = arith.constant 0.000000e+00 : f32
    %6 = vector.broadcast %cst_5 : f32 to vector<8x64xf32>
    %7 = arith.maximumf %5, %6 : vector<8x64xf32>
    %c0_6 = arith.constant 0 : index
    %c0_7 = arith.constant 0 : index
    %8 = vector.load %arg4[%c0_6, %c0_7] : memref<64x64xf32, #tpu.memory_space<vmem>>, vector<64x64xf32>
    %cst_8 = arith.constant dense<0.000000e+00> : vector<8x64xf32>
    %9 = tpu.matmul %7, %8, %cst_8 {dimension_numbers = #tpu.dot_dimension_numbers<[1], [0], [0], [1], [0, 0, 1, 1], [], []>} : vector<8x64xf32>, vector<64x64xf32>, vector<8x64xf32> -> vector<8x64xf32>
    %c0_9 = arith.constant 0 : index
    %c0_10 = arith.constant 0 : index
    %10 = vector.load %arg5[%c0_9, %c0_10] : memref<1x64xf32, #tpu.memory_space<vmem>>, vector<1x64xf32>
    %11 = vector.broadcast %10 : vector<1x64xf32> to vector<8x64xf32>
    %12 = arith.addf %9, %11 : vector<8x64xf32>
    %cst_11 = arith.constant 0.000000e+00 : f32
    %13 = vector.broadcast %cst_11 : f32 to vector<8x64xf32>
    %14 = arith.maximumf %12, %13 : vector<8x64xf32>
    %c0_12 = arith.constant 0 : index
    %c0_13 = arith.constant 0 : index
    %15 = vector.load %arg6[%c0_12, %c0_13] : memref<64x4xf32, #tpu.memory_space<vmem>>, vector<64x4xf32>
    %cst_14 = arith.constant dense<0.000000e+00> : vector<8x4xf32>
    %16 = tpu.matmul %14, %15, %cst_14 {dimension_numbers = #tpu.dot_dimension_numbers<[1], [0], [0], [1], [0, 0, 1, 1], [], []>} : vector<8x64xf32>, vector<64x4xf32>, vector<8x4xf32> -> vector<8x4xf32>
    %c0_15 = arith.constant 0 : index
    %c0_16 = arith.constant 0 : index
    %17 = vector.load %arg7[%c0_15, %c0_16] : memref<1x4xf32, #tpu.memory_space<vmem>>, vector<1x4xf32>
    %18 = vector.broadcast %17 : vector<1x4xf32> to vector<8x4xf32>
    %19 = arith.addf %16, %18 : vector<8x4xf32>
    %c0_17 = arith.constant 0 : index
    %c0_18 = arith.constant 0 : index
    %20 = vector.load %arg8[%c0_17, %c0_18] : memref<8x4xf32, #tpu.memory_space<vmem>>, vector<8x4xf32>
    tpu.vector_store %arg8[%c0_17, %c0_18], %19 {strides = array<i32>} : memref<8x4xf32, #tpu.memory_space<vmem>>, vector<8x4xf32>,
    return
  }
  func.func @transform_0(%arg0: i32) -> (i32, i32) {
    %c0_i32 = arith.constant 0 : i32
    %c0_i32_0 = arith.constant 0 : i32
    return %arg0, %c0_i32 : i32, i32
  }
  func.func @transform_1(%arg0: i32) -> (i32, i32) {
    %c0_i32 = arith.constant 0 : i32
    %c0_i32_0 = arith.constant 0 : i32
    %c0_i32_1 = arith.constant 0 : i32
    return %c0_i32, %c0_i32_0 : i32, i32
  }
  func.func @transform_2(%arg0: i32) -> (i32, i32) {
    %c0_i32 = arith.constant 0 : i32
    %c0_i32_0 = arith.constant 0 : i32
    %c0_i32_1 = arith.constant 0 : i32
    return %c0_i32, %c0_i32_0 : i32, i32
  }
  func.func @transform_3(%arg0: i32) -> (i32, i32) {
    %c0_i32 = arith.constant 0 : i32
    %c0_i32_0 = arith.constant 0 : i32
    %c0_i32_1 = arith.constant 0 : i32
    return %c0_i32, %c0_i32_0 : i32, i32
  }
  func.func @transform_4(%arg0: i32) -> (i32, i32) {
    %c0_i32 = arith.constant 0 : i32
    %c0_i32_0 = arith.constant 0 : i32
    %c0_i32_1 = arith.constant 0 : i32
    return %c0_i32, %c0_i32_0 : i32, i32
  }
  func.func @transform_5(%arg0: i32) -> (i32, i32) {
    %c0_i32 = arith.constant 0 : i32
    %c0_i32_0 = arith.constant 0 : i32
    %c0_i32_1 = arith.constant 0 : i32
    return %c0_i32, %c0_i32_0 : i32, i32
  }
  func.func @transform_6(%arg0: i32) -> (i32, i32) {
    %c0_i32 = arith.constant 0 : i32
    %c0_i32_0 = arith.constant 0 : i32
    %c0_i32_1 = arith.constant 0 : i32
    return %c0_i32, %c0_i32_0 : i32, i32
  }
  func.func @transform_7(%arg0: i32) -> (i32, i32) {
    %c0_i32 = arith.constant 0 : i32
    %c0_i32_0 = arith.constant 0 : i32
    return %arg0, %c0_i32 : i32, i32
  }
}

</mosaic_0001>

<bundles_post_ra>
// kernel: dqn_forward.1
= control target key start
LH: loop header
LB: loop body
LE: loop exit
PB: predicated region body
PF: predicated region fallthrough
CT: control target
= control target key end

     0   :  { %12 = vsyncpa [#allocation3], 0  ;;  %s439_s24 = smov [#allocation2]   ;;  %s563_s0 = inlined_call_operand.vmem [shape: f32[8,16], index: 0, kind: input, shape index: {}]   ;;  %s564_s1 = inlined_call_operand.hbm [shape: f32[16,64], index: 1, kind: input, shape index: {}]   ;;  %s565_s2 = inlined_call_operand.vmem [shape: f32[1,64], index: 2, kind: input, shape index: {}]   ;;  %s566_s3 = inlined_call_operand.vmem [shape: f32[64,64], index: 3, kind: input, shape index: {}]   ;;  %s567_s4 = inlined_call_operand.vmem [shape: f32[1,64], index: 4, kind: input, shape index: {}]   ;;  %s568_s5 = inlined_call_operand.vmem [shape: f32[64,4], index: 5, kind: input, shape index: {}]   ;;  %s569_s6 = inlined_call_operand.vmem [shape: f32[1,4], index: 6, kind: input, shape index: {}]   ;;  %s570_s7 = inlined_call_operand.vmem [shape: f32[8,4], index: 7, kind: output, shape index: {}]  }
   0x1   :  { %s20_s25 = sshll.u32 %s439_s24, 4  ;;  %s415_s28 = scalar_lea.hbm %s564_s1, 256  ;;  %s21_s25 = int_to_ptr.vmem [resolvable:$true] %s20_s25 }
   0x2   :  { %p416_p0 = scmp.ne.s32.totalorder %s564_s1, %s415_s28  ;;  %p419_p1 = scmp.lt.u32.totalorder %s415_s28, %s564_s1 }
   0x4   :  { %p421_p2 = pnand %p419_p1, %p416_p0 }
   0x6   :  { %424 = shalt.err (!%p421_p2)
}
   0x7   :  { %s425_s10 = scalar_lea.vmem %s21_s25, 256  ;;  %p430_p4 = scmp.lt.s32.totalorder %s21_s25, %s21_s25 }
   0x8   :  { %p426_p3 = scmp.ne.s32.totalorder %s21_s25, %s425_s10  ;;  %p431_p5 = scmp.lt.s32.totalorder %s425_s10, %s425_s10 }
   0xa   :  { %p432_p6 = por %p431_p5, %p430_p4 }
   0xc   :  { %p433_p7 = pnand %p432_p6, %p426_p3 }
   0xe   :  { %436 = shalt.err (!%p433_p7)
}
   0xf   :  { %s440_s11 = smov 128   ;;  %s441_s12 = smov 8  }
  0x10   :  { %26 = dma.hbm_to_vmem [thread:$0]  %s564_s1, 256, %s21_s25, [#allocation3], %s440_s11, %s440_s11, %s441_s12  }
  0x11   :  { %437 = dma.done.wait [#allocation3], 256  }
  0x12   :  { %438 = vsyncadd [#allocation3], 4294967040  ;;  %v442_v0 = vmov 0.0|0.0   ;;  %vm443_vm0 = vmmov 0   ;;  %v444_v1 = vmov 0.0   ;;  %v41_v2 = vld [vmem:[#allocation2] sm:$0xff] }
  0x13   :  { %382 = vmatprep.subr.bf16.mxu0 %v442_v0  ;;  %341 = vmatprep.mubr.msk.f32.mxu0 %vm443_vm0, %v444_v1  ;;  %v42_v3 = vld [vmem:[#allocation2 + $0x8] sm:$0xff]  ;;  %v125_v5 = vld [vmem:[%s566_s3] sm:$0xff]  ;;  %v127_v7 = vld [vmem:[%s566_s3 + $0x10] sm:$0xff]  ;;  %vm50_vm1 = vcmask 130048   ;;  %vm140_vm2 = vcmask 523264   ;;  %vm303_vm3 = vcmask 31744  }
  0x14   :  { %385 = vmatprep.subr.bf16.mxu1 %v442_v0  ;;  %360 = vmatprep.mubr.msk.f32.mxu1 %vm443_vm0, %v444_v1  ;;  %v383_v4 = vpack.c.bf16 %v42_v3, %v41_v2  ;;  %v126_v6 = vld [vmem:[%s566_s3 + $0x8] sm:$0xff]  ;;  %v128_v9 = vld [vmem:[%s566_s3 + $0x18] sm:$0xff]  ;;  %v40_v10 = vld [vmem:[%s563_s0] sm:$0xff] }
  0x15   :  { %v386_v8 = vpack.c.bf16 %v126_v6, %v125_v5  ;;  %v389_v11 = vpack.c.bf16 %v128_v9, %v127_v7  ;;  %v129_v12 = vld [vmem:[%s566_s3 + $0x20] sm:$0xff]  ;;  %v130_v13 = vld [vmem:[%s566_s3 + $0x28] sm:$0xff]  ;;  %v131_v15 = vld [vmem:[%s566_s3 + $0x30] sm:$0xff] }
  0x16   :  { %384 = vmatpush3.bf16.msra.mxu0 %v383_v4  ;;  %v392_v14 = vpack.c.bf16 %v130_v13, %v129_v12  ;;  %v132_v16 = vld [vmem:[%s566_s3 + $0x38] sm:$0xff]  ;;  %v215_v18 = vld [vmem:[%s568_s5] sm:$0xff]  ;;  %v216_v19 = vld [vmem:[%s568_s5 + $0x8] sm:$0xff] }
  0x17   :  { %387 = vmatpush3.bf16.msra.mxu1 %v386_v8  ;;  %397 = vmatprep.subr.bf16.mxu0 %v442_v0  ;;  %v395_v17 = vpack.c.bf16 %v132_v16, %v131_v15  ;;  %v217_v20 = vld [vmem:[%s568_s5 + $0x10] sm:$0xff]  ;;  %v398_v21 = vpack.c.bf16 %v216_v19, %v215_v18  ;;  %v218_v22 = vld [vmem:[%s568_s5 + $0x18] sm:$0xff]  ;;  %v219_v24 = vld [vmem:[%s568_s5 + $0x20] sm:$0xff] }
  0x18   :  { %388 = vmatprep.subr.bf16.mxu1 %v442_v0  ;;  %v401_v23 = vpack.c.bf16 %v218_v22, %v217_v20  ;;  %v220_v25 = vld [vmem:[%s568_s5 + $0x28] sm:$0xff]  ;;  %v310_v27 = vld [vmem:[%s565_s2] ss:$0 sm:$0xff]  ;;  %v221_v32 = vld [vmem:[%s568_s5 + $0x30] sm:$0xff] }
  0x19   :  { %342 = vmatmul.mubr.msk.f32.vlgmr.msra.gmra.mrb[0].mxu0 %vm50_vm1, %v40_v10  ;;  %v404_v26 = vpack.c.bf16 %v220_v25, %v219_v24  ;;  %v222_v33 = vld [vmem:[%s568_s5 + $0x38] sm:$0xff]  ;;  %v312_v35 = vld [vmem:[%s567_s4] ss:$0 sm:$0xff] }
  0x1a   :  { %379 = vmatprep.mubr.msk.f32.mxu0 %vm443_vm0, %v444_v1  ;;  %399 = vmatpush3.bf16.msra.mxu0 %v398_v21  ;;  %v407_v34 = vpack.c.bf16 %v222_v33, %v221_v32  ;;  %v314_v40 = vld [vmem:[%s569_s6] ss:$0 sm:$0xff] }
  0x1b   :  { %390 = vmatpush3.bf16.msra.mxu1 %v389_v11  ;;  %400 = vmatprep.subr.bf16.mxu0 %v442_v0 }
  0x1c   :  { %391 = vmatprep.subr.bf16.mxu1 %v442_v0 }
  0x1e   :  { %402 = vmatpush3.bf16.msra.mxu0 %v401_v23 }
  0x1f   :  { %393 = vmatpush3.bf16.msra.mxu1 %v392_v14  ;;  %403 = vmatprep.subr.bf16.mxu0 %v442_v0 }
  0x20   :  { %394 = vmatprep.subr.bf16.mxu1 %v442_v0 }
  0x22   :  { %405 = vmatpush3.bf16.msra.mxu0 %v404_v26 }
  0x23   :  { %396 = vmatpush3.bf16.msra.mxu1 %v395_v17  ;;  %406 = vmatprep.subr.bf16.mxu0 %v442_v0 }
  0x26   :  { %408 = vmatpush3.bf16.msra.mxu0 %v407_v34 }
  0xec   :  { %v120_v28 = vpop.f32.mrb[0].mxu0 }
  0xed   :  { %v121_v29 = vadd.f32 %v310_v27, %v120_v28  ;;  %v343_v30 = vpop.f32.mrb[1].mxu0 }
  0xef   :  { %v124_v31 = vmax.f32 %v121_v29, 0.0 }
  0xf1   :  { %361 = vmatmul.mubr.msk.f32.vlgmr.msra.gmra.mrb[0].mxu1 %vm140_vm2, %v124_v31 }
 0x1c4   :  { %v210_v36 = vpop.f32.mrb[0].mxu1 }
 0x1c5   :  { %v211_v37 = vadd.f32 %v312_v35, %v210_v36  ;;  %v362_v38 = vpop.f32.mrb[1].mxu1 }
 0x1c7   :  { %v214_v39 = vmax.f32 %v211_v37, 0.0 }
 0x1c9   :  { %380 = vmatmul.mubr.msk.f32.vlgmr.msra.gmra.mrb[2].mxu0 %vm140_vm2, %v214_v39 }
 0x29c   :  { %v299_v41 = vpop.f32.mrb[2].mxu0 }
 0x29d   :  { %v300_v42 = vadd.f32 %v314_v40, %v299_v41  ;;  %v381_v43 = vpop.f32.mrb[3].mxu0 }
 0x29f   :  { %304 = vst.msk [vmem:[%s570_s7] sm:$0xff] %vm303_vm3, %v300_v42 }
 0x2a0   :  { %309 = vsyncpa [#allocation3], 1 }

</bundles_post_ra>
